<compile_context>
chip_gen: v7x
topology: tpu7x:2x2x1
jax: 0.10.0
libtpu: 0.0.40
codegen_flags: <defaults>
</compile_context>

<pallas_src>
import functools

import jax
import jax.numpy as jnp
from jax.experimental import pallas as pl
from jax.experimental.pallas import tpu as pltpu

EPS = 1e-5  # nn.InstanceNorm2d default eps


def _tap_deltas_and_masks(h, w, k):
    """Per-tap flat-index shift + (K*K, H*W) validity masks ('SAME' zero pad)."""
    s = h * w
    idx = jnp.arange(s, dtype=jnp.int32)
    yy = idx // w
    xx = idx % w
    r = (k - 1) // 2
    deltas, masks = [], []
    for ky in range(k):
        for kx in range(k):
            dy, dx = ky - r, kx - r
            valid = ((yy + dy >= 0) & (yy + dy < h) &
                     (xx + dx >= 0) & (xx + dx < w))
            deltas.append(dy * w + dx)
            masks.append(valid)
    return tuple(deltas), jnp.stack(masks).astype(jnp.float32)   # (K*K, S)


def _conv_in_relu(act, wmat, mask_full, deltas):
    """Conv2d(k, stride=1, 'SAME', no bias) + InstanceNorm + ReLU for one image.

    act:       (C, S)         f32, flat spatial on the lane axis
    wmat:      (Cout, K*K*C)  matmul dtype, columns ordered (ky, kx, c)
    mask_full: (K*K*C, S)     f32 border masks (per-tap mask repeated C times)
    returns    (Cout, S)      f32
    """
    s = act.shape[-1]
    # im2col via XLU lane rotations; one masked multiply on the assembled matrix
    # realizes the zero 'SAME' padding (and kills any cross-image roll leakage).
    cols = [act if (-d) % s == 0 else pltpu.roll(act, shift=(-d) % s, axis=1)
            for d in deltas]
    xcol = jnp.concatenate(cols, axis=0) * mask_full            # (K*K*C, S) f32

    # Single lane-dense MXU matmul: M=Cout, K=K*K*C, N=S.
    y = jnp.dot(wmat, xcol.astype(wmat.dtype),
                preferred_element_type=jnp.float32)             # (Cout, S) f32

    # InstanceNorm2d(affine=False): two-pass (numerically safe) biased variance.
    mean = jnp.mean(y, axis=1, keepdims=True)
    cen = y - mean
    var = jnp.mean(cen * cen, axis=1, keepdims=True)
    normed = cen * jax.lax.rsqrt(var + EPS)

    # Dropout(p=0.0) is a no-op; then ReLU ('NDA' ordering).
    return jnp.maximum(normed, 0.0)


def conv_block_kernel(x_ref, w1_ref, w2_ref, m1_ref, m2_ref, o_ref, *,
                      nb, deltas):
    """Fused ConvBlock forward for NB images per grid step.

    x_ref:  (NB, Cin_p, S)      w1_ref: (Cout, K*K*Cin_p)
    o_ref:  (NB, Cout,  S)      w2_ref: (Cout, K*K*Cout)
    m1_ref: (K*K*Cin_p, S)      m2_ref: (K*K*Cout, S)
    """
    w1 = w1_ref[...]
    w2 = w2_ref[...]
    m1 = m1_ref[...]
    m2 = m2_ref[...]
    for b in range(nb):                          # static unroll: NB images/step
        x = x_ref[b].astype(jnp.float32)         # (Cin_p, S)
        a1 = _conv_in_relu(x, w1, m1, deltas)    # intermediate stays on-chip
        a2 = _conv_in_relu(a1, w2, m2, deltas)
        o_ref[b] = a2.astype(o_ref.dtype)        # full-lane (Cout, S) store


def conv_block(x_nchw, params, *, matmul_dtype=jnp.float32, images_per_step=None):
    """Full ConvBlock forward. Input/output are NCHW to match the PyTorch module."""
    n, cin, h, w = x_nchw.shape
    k, _, _, cout = params["w1"].shape                    # HWIO weights
    s = h * w

    # Sublane-align the stage-1 im2col blocks: pad Cin up to a multiple of 8.
    cin_p = -(-cin // 8) * 8

    # Grid sizing: pack several images per step to amortize the ~0.35us/step
    # fixed cost, but keep >=2 'parallel' steps when N>=2 (v7x has 2 TCs).
    if images_per_step is None:
        min_steps = 2 if n >= 2 else 1
        steps = max(min_steps, pl.cdiv(n, 8))             # cap ~8 images/step
        images_per_step = pl.cdiv(n, steps)
    nb = max(1, int(images_per_step))
    steps = pl.cdiv(n, nb)
    n_pad = steps * nb

    # Weight matrices with column order (ky, kx, c) matching the im2col rows.
    w1t = jnp.transpose(params["w1"], (3, 0, 1, 2))       # (Cout, K, K, Cin)
    w1t = jnp.pad(w1t, ((0, 0), (0, 0), (0, 0), (0, cin_p - cin)))
    wmat1 = w1t.reshape(cout, k * k * cin_p).astype(matmul_dtype)
    wmat2 = jnp.transpose(params["w2"], (3, 0, 1, 2)
                          ).reshape(cout, k * k * cout).astype(matmul_dtype)
    # NOTE: b1/b2 intentionally unused — InstanceNorm(affine=False) cancels the
    # conv bias exactly (only valid for this norm / 'NDA' / dropout=0 config).

    # Precomputed border masks, expanded per stage so the kernel applies them
    # with a single elementwise multiply on the assembled xcol.
    deltas, tap_masks = _tap_deltas_and_masks(h, w, k)    # (K*K, S)
    mask1 = jnp.repeat(tap_masks, cin_p, axis=0)          # (K*K*Cin_p, S)
    mask2 = jnp.repeat(tap_masks, cout, axis=0)           # (K*K*Cout,  S)

    # NCHW -> (N, C, S) is a free reshape; pad batch/channels with zeros
    # (zero images stay zero through conv+IN+ReLU and are sliced off below).
    x_flat = x_nchw.reshape(n, cin, s)
    x_flat = jnp.pad(x_flat, ((0, n_pad - n), (0, cin_p - cin), (0, 0)))

    kern = functools.partial(conv_block_kernel, nb=nb, deltas=deltas)
    out = pl.pallas_call(
        kern,
        out_shape=jax.ShapeDtypeStruct((n_pad, cout, s), x_nchw.dtype),
        grid=(steps,),
        in_specs=[
            pl.BlockSpec((nb, cin_p, s), lambda i: (i, 0, 0)),
            pl.BlockSpec((cout, k * k * cin_p), lambda i: (0, 0)),
            pl.BlockSpec((cout, k * k * cout), lambda i: (0, 0)),
            pl.BlockSpec((k * k * cin_p, s), lambda i: (0, 0)),
            pl.BlockSpec((k * k * cout, s), lambda i: (0, 0)),
        ],
        out_specs=pl.BlockSpec((nb, cout, s), lambda i: (i, 0, 0)),
        compiler_params=pltpu.CompilerParams(
            dimension_semantics=("parallel",)),           # steps -> both v7x TCs
    )(x_flat, wmat1, wmat2, mask1, mask2)
    return out[:n].reshape(n, cout, h, w)


# ----------------------------------------------------------------------------
# Pure-JAX reference (with bias, to also validate the bias-cancellation).
# ----------------------------------------------------------------------------
def ref_conv_in_relu(x, w, b):
    y = jax.lax.conv_general_dilated(
        x, w, window_strides=(1, 1), padding="SAME",
        dimension_numbers=("NCHW", "HWIO", "NCHW")) + b.reshape(1, -1, 1, 1)
    mean = y.mean(axis=(2, 3), keepdims=True)
    var = ((y - mean) ** 2).mean(axis=(2, 3), keepdims=True)
    y = (y - mean) * jax.lax.rsqrt(var + EPS)
    return jnp.maximum(y, 0.0)


def ref_conv_block(x, params):
    y = ref_conv_in_relu(x, params["w1"], params["b1"])
    return ref_conv_in_relu(y, params["w2"], params["b2"])


if __name__ == "__main__":
    # ConvBlock(spatial_dims=2, in_channels=4, out_channels=8, kernel_size=3,
    #           strides=1, dropout=0.0, norm_type='INSTANCE')
    # N=4 so the default grid is 2 'parallel' steps x 2 images per step.
    N, Cin, Cout, H, W, K = 4, 4, 8, 16, 16, 3

    key = jax.random.PRNGKey(0)
    kx, kw1, kb1, kw2, kb2 = jax.random.split(key, 5)

    x_nchw = jax.random.normal(kx, (N, Cin, H, W), jnp.float32)
    params = {
        "w1": jax.random.normal(kw1, (K, K, Cin, Cout), jnp.float32) * 0.1,
        "b1": jax.random.normal(kb1, (Cout,), jnp.float32) * 0.1,
        "w2": jax.random.normal(kw2, (K, K, Cout, Cout), jnp.float32) * 0.1,
        "b2": jax.random.normal(kb2, (Cout,), jnp.float32) * 0.1,
    }

    ref = jax.block_until_ready(ref_conv_block(x_nchw, params))

    # f32 MXU operands: strict check (matches the reference to fp32 accuracy).
    out = jax.block_until_ready(conv_block(x_nchw, params))
    assert out.shape == (N, Cout, H, W), out.shape
    assert jnp.allclose(out, ref, atol=1e-4, rtol=1e-4), \
        float(jnp.abs(out - ref).max())

    # bf16 MXU operands (review opt #4): looser tolerance, f32 accumulate/VPU.
    out_bf16 = jax.block_until_ready(
        conv_block(x_nchw, params, matmul_dtype=jnp.bfloat16))
    assert jnp.allclose(out_bf16, ref, atol=1e-1, rtol=1e-1), \
        float(jnp.abs(out_bf16 - ref).max())

    print("KERNEL_OK")
</pallas_src>

<mosaic_0001>
module attributes {stable_mosaic.version = 11 : i64} {
  func.func @conv_block_kernel(%arg0: i32, %arg1: memref<2x8x256xf32, #tpu.memory_space<vmem>>, %arg2: memref<8x72xf32, #tpu.memory_space<vmem>>, %arg3: memref<8x72xf32, #tpu.memory_space<vmem>>, %arg4: memref<72x256xf32, #tpu.memory_space<vmem>>, %arg5: memref<72x256xf32, #tpu.memory_space<vmem>>, %arg6: memref<2x8x256xf32, #tpu.memory_space<vmem>>) attributes {dimension_semantics = [#tpu.dimension_semantics<parallel>], iteration_bounds = array<i64: 2>, scalar_prefetch = 0 : i64, scratch_operands = 0 : i64, tpu.core_type = #tpu.core_type<tc>, window_params = [{transform_indices = @transform_0, window_bounds = array<i64: 2, 8, 256>}, {pipeline_mode = #tpu.pipeline_mode<synchronous>, transform_indices = @transform_1, window_bounds = array<i64: 8, 72>}, {pipeline_mode = #tpu.pipeline_mode<synchronous>, transform_indices = @transform_2, window_bounds = array<i64: 8, 72>}, {pipeline_mode = #tpu.pipeline_mode<synchronous>, transform_indices = @transform_3, window_bounds = array<i64: 72, 256>}, {pipeline_mode = #tpu.pipeline_mode<synchronous>, transform_indices = @transform_4, window_bounds = array<i64: 72, 256>}, {transform_indices = @transform_5, window_bounds = array<i64: 2, 8, 256>}]} {
    %c0 = arith.constant 0 : index
    %c0_0 = arith.constant 0 : index
    %0 = vector.load %arg2[%c0, %c0_0] : memref<8x72xf32, #tpu.memory_space<vmem>>, vector<8x72xf32>
    %c0_1 = arith.constant 0 : index
    %c0_2 = arith.constant 0 : index
    %1 = vector.load %arg3[%c0_1, %c0_2] : memref<8x72xf32, #tpu.memory_space<vmem>>, vector<8x72xf32>
    %c0_3 = arith.constant 0 : index
    %c0_4 = arith.constant 0 : index
    %2 = vector.load %arg4[%c0_3, %c0_4] : memref<72x256xf32, #tpu.memory_space<vmem>>, vector<72x256xf32>
    %c0_5 = arith.constant 0 : index
    %c0_6 = arith.constant 0 : index
    %3 = vector.load %arg5[%c0_5, %c0_6] : memref<72x256xf32, #tpu.memory_space<vmem>>, vector<72x256xf32>
    %c0_7 = arith.constant 0 : index
    %c0_8 = arith.constant 0 : index
    %c0_9 = arith.constant 0 : index
    %4 = vector.load %arg1[%c0_7, %c0_8, %c0_9] : memref<2x8x256xf32, #tpu.memory_space<vmem>>, vector<1x8x256xf32>
    %5 = vector.shape_cast %4 : vector<1x8x256xf32> to vector<8x256xf32>
    %c17_i32 = arith.constant 17 : i32
    %6 = tpu.dynamic_rotate %5 by %c17_i32 dim 1 : vector<8x256xf32>, i32 -> vector<8x256xf32>
    %c16_i32 = arith.constant 16 : i32
    %7 = tpu.dynamic_rotate %5 by %c16_i32 dim 1 : vector<8x256xf32>, i32 -> vector<8x256xf32>
    %c15_i32 = arith.constant 15 : i32
    %8 = tpu.dynamic_rotate %5 by %c15_i32 dim 1 : vector<8x256xf32>, i32 -> vector<8x256xf32>
    %c1_i32 = arith.constant 1 : i32
    %9 = tpu.dynamic_rotate %5 by %c1_i32 dim 1 : vector<8x256xf32>, i32 -> vector<8x256xf32>
    %c255_i32 = arith.constant 255 : i32
    %10 = tpu.dynamic_rotate %5 by %c255_i32 dim 1 : vector<8x256xf32>, i32 -> vector<8x256xf32>
    %c241_i32 = arith.constant 241 : i32
    %11 = tpu.dynamic_rotate %5 by %c241_i32 dim 1 : vector<8x256xf32>, i32 -> vector<8x256xf32>
    %c240_i32 = arith.constant 240 : i32
    %12 = tpu.dynamic_rotate %5 by %c240_i32 dim 1 : vector<8x256xf32>, i32 -> vector<8x256xf32>
    %c239_i32 = arith.constant 239 : i32
    %13 = tpu.dynamic_rotate %5 by %c239_i32 dim 1 : vector<8x256xf32>, i32 -> vector<8x256xf32>
    %14 = tpu.concatenate %6, %7, %8, %9, %5, %10, %11, %12, %13 in 0 : vector<8x256xf32>, vector<8x256xf32>, vector<8x256xf32>, vector<8x256xf32>, vector<8x256xf32>, vector<8x256xf32>, vector<8x256xf32>, vector<8x256xf32>, vector<8x256xf32> -> vector<72x256xf32>
    %15 = arith.mulf %14, %2 : vector<72x256xf32>
    %cst = arith.constant dense<0.000000e+00> : vector<8x256xf32>
    %16 = tpu.matmul %0, %15, %cst {dimension_numbers = #tpu.dot_dimension_numbers<[1], [0], [0], [1], [0, 0, 1, 1], [], []>} : vector<8x72xf32>, vector<72x256xf32>, vector<8x256xf32> -> vector<8x256xf32>
    %cst_10 = arith.constant dense<0.000000e+00> : vector<8xf32>
    %17 = vector.multi_reduction <add>, %16, %cst_10 [1] : vector<8x256xf32> to vector<8xf32>
    %18 = vector.shape_cast %17 : vector<8xf32> to vector<8x1xf32>
    %cst_11 = arith.constant 2.560000e+02 : f32
    %19 = vector.broadcast %cst_11 : f32 to vector<8x1xf32>
    %20 = arith.divf %18, %19 : vector<8x1xf32>
    %21 = vector.broadcast %20 : vector<8x1xf32> to vector<8x256xf32>
    %22 = arith.subf %16, %21 : vector<8x256xf32>
    %23 = arith.mulf %22, %22 : vector<8x256xf32>
    %cst_12 = arith.constant dense<0.000000e+00> : vector<8xf32>
    %24 = vector.multi_reduction <add>, %23, %cst_12 [1] : vector<8x256xf32> to vector<8xf32>
    %25 = vector.shape_cast %24 : vector<8xf32> to vector<8x1xf32>
    %cst_13 = arith.constant 2.560000e+02 : f32
    %26 = vector.broadcast %cst_13 : f32 to vector<8x1xf32>
    %27 = arith.divf %25, %26 : vector<8x1xf32>
    %cst_14 = arith.constant 9.99999974E-6 : f32
    %28 = vector.broadcast %cst_14 : f32 to vector<8x1xf32>
    %29 = arith.addf %27, %28 : vector<8x1xf32>
    %30 = math.rsqrt %29 : vector<8x1xf32>
    %31 = vector.broadcast %30 : vector<8x1xf32> to vector<8x256xf32>
    %32 = arith.mulf %22, %31 : vector<8x256xf32>
    %cst_15 = arith.constant 0.000000e+00 : f32
    %33 = vector.broadcast %cst_15 : f32 to vector<8x256xf32>
    %34 = arith.maximumf %32, %33 : vector<8x256xf32>
    %c17_i32_16 = arith.constant 17 : i32
    %35 = tpu.dynamic_rotate %34 by %c17_i32_16 dim 1 : vector<8x256xf32>, i32 -> vector<8x256xf32>
    %c16_i32_17 = arith.constant 16 : i32
    %36 = tpu.dynamic_rotate %34 by %c16_i32_17 dim 1 : vector<8x256xf32>, i32 -> vector<8x256xf32>
    %c15_i32_18 = arith.constant 15 : i32
    %37 = tpu.dynamic_rotate %34 by %c15_i32_18 dim 1 : vector<8x256xf32>, i32 -> vector<8x256xf32>
    %c1_i32_19 = arith.constant 1 : i32
    %38 = tpu.dynamic_rotate %34 by %c1_i32_19 dim 1 : vector<8x256xf32>, i32 -> vector<8x256xf32>
    %c255_i32_20 = arith.constant 255 : i32
    %39 = tpu.dynamic_rotate %34 by %c255_i32_20 dim 1 : vector<8x256xf32>, i32 -> vector<8x256xf32>
    %c241_i32_21 = arith.constant 241 : i32
    %40 = tpu.dynamic_rotate %34 by %c241_i32_21 dim 1 : vector<8x256xf32>, i32 -> vector<8x256xf32>
    %c240_i32_22 = arith.constant 240 : i32
    %41 = tpu.dynamic_rotate %34 by %c240_i32_22 dim 1 : vector<8x256xf32>, i32 -> vector<8x256xf32>
    %c239_i32_23 = arith.constant 239 : i32
    %42 = tpu.dynamic_rotate %34 by %c239_i32_23 dim 1 : vector<8x256xf32>, i32 -> vector<8x256xf32>
    %43 = tpu.concatenate %35, %36, %37, %38, %34, %39, %40, %41, %42 in 0 : vector<8x256xf32>, vector<8x256xf32>, vector<8x256xf32>, vector<8x256xf32>, vector<8x256xf32>, vector<8x256xf32>, vector<8x256xf32>, vector<8x256xf32>, vector<8x256xf32> -> vector<72x256xf32>
    %44 = arith.mulf %43, %3 : vector<72x256xf32>
    %cst_24 = arith.constant dense<0.000000e+00> : vector<8x256xf32>
    %45 = tpu.matmul %1, %44, %cst_24 {dimension_numbers = #tpu.dot_dimension_numbers<[1], [0], [0], [1], [0, 0, 1, 1], [], []>} : vector<8x72xf32>, vector<72x256xf32>, vector<8x256xf32> -> vector<8x256xf32>
    %cst_25 = arith.constant dense<0.000000e+00> : vector<8xf32>
    %46 = vector.multi_reduction <add>, %45, %cst_25 [1] : vector<8x256xf32> to vector<8xf32>
    %47 = vector.shape_cast %46 : vector<8xf32> to vector<8x1xf32>
    %cst_26 = arith.constant 2.560000e+02 : f32
    %48 = vector.broadcast %cst_26 : f32 to vector<8x1xf32>
    %49 = arith.divf %47, %48 : vector<8x1xf32>
    %50 = vector.broadcast %49 : vector<8x1xf32> to vector<8x256xf32>
    %51 = arith.subf %45, %50 : vector<8x256xf32>
    %52 = arith.mulf %51, %51 : vector<8x256xf32>
    %cst_27 = arith.constant dense<0.000000e+00> : vector<8xf32>
    %53 = vector.multi_reduction <add>, %52, %cst_27 [1] : vector<8x256xf32> to vector<8xf32>
    %54 = vector.shape_cast %53 : vector<8xf32> to vector<8x1xf32>
    %cst_28 = arith.constant 2.560000e+02 : f32
    %55 = vector.broadcast %cst_28 : f32 to vector<8x1xf32>
    %56 = arith.divf %54, %55 : vector<8x1xf32>
    %cst_29 = arith.constant 9.99999974E-6 : f32
    %57 = vector.broadcast %cst_29 : f32 to vector<8x1xf32>
    %58 = arith.addf %56, %57 : vector<8x1xf32>
    %59 = math.rsqrt %58 : vector<8x1xf32>
    %60 = vector.broadcast %59 : vector<8x1xf32> to vector<8x256xf32>
    %61 = arith.mulf %51, %60 : vector<8x256xf32>
    %cst_30 = arith.constant 0.000000e+00 : f32
    %62 = vector.broadcast %cst_30 : f32 to vector<8x256xf32>
    %63 = arith.maximumf %61, %62 : vector<8x256xf32>
    %c0_31 = arith.constant 0 : index
    %c0_32 = arith.constant 0 : index
    %c0_33 = arith.constant 0 : index
    %64 = vector.load %arg6[%c0_31, %c0_32, %c0_33] : memref<2x8x256xf32, #tpu.memory_space<vmem>>, vector<1x8x256xf32>
    %65 = vector.shape_cast %64 : vector<1x8x256xf32> to vector<8x256xf32>
    %66 = vector.shape_cast %63 : vector<8x256xf32> to vector<1x8x256xf32>
    tpu.vector_store %arg6[%c0_31, %c0_32, %c0_33], %66 {strides = array<i32>} : memref<2x8x256xf32, #tpu.memory_space<vmem>>, vector<1x8x256xf32>,
    %c1 = arith.constant 1 : index
    %c0_34 = arith.constant 0 : index
    %c0_35 = arith.constant 0 : index
    %67 = vector.load %arg1[%c1, %c0_34, %c0_35] : memref<2x8x256xf32, #tpu.memory_space<vmem>>, vector<1x8x256xf32>
    %68 = vector.shape_cast %67 : vector<1x8x256xf32> to vector<8x256xf32>
    %c17_i32_36 = arith.constant 17 : i32
    %69 = tpu.dynamic_rotate %68 by %c17_i32_36 dim 1 : vector<8x256xf32>, i32 -> vector<8x256xf32>
    %c16_i32_37 = arith.constant 16 : i32
    %70 = tpu.dynamic_rotate %68 by %c16_i32_37 dim 1 : vector<8x256xf32>, i32 -> vector<8x256xf32>
    %c15_i32_38 = arith.constant 15 : i32
    %71 = tpu.dynamic_rotate %68 by %c15_i32_38 dim 1 : vector<8x256xf32>, i32 -> vector<8x256xf32>
    %c1_i32_39 = arith.constant 1 : i32
    %72 = tpu.dynamic_rotate %68 by %c1_i32_39 dim 1 : vector<8x256xf32>, i32 -> vector<8x256xf32>
    %c255_i32_40 = arith.constant 255 : i32
    %73 = tpu.dynamic_rotate %68 by %c255_i32_40 dim 1 : vector<8x256xf32>, i32 -> vector<8x256xf32>
    %c241_i32_41 = arith.constant 241 : i32
    %74 = tpu.dynamic_rotate %68 by %c241_i32_41 dim 1 : vector<8x256xf32>, i32 -> vector<8x256xf32>
    %c240_i32_42 = arith.constant 240 : i32
    %75 = tpu.dynamic_rotate %68 by %c240_i32_42 dim 1 : vector<8x256xf32>, i32 -> vector<8x256xf32>
    %c239_i32_43 = arith.constant 239 : i32
    %76 = tpu.dynamic_rotate %68 by %c239_i32_43 dim 1 : vector<8x256xf32>, i32 -> vector<8x256xf32>
    %77 = tpu.concatenate %69, %70, %71, %72, %68, %73, %74, %75, %76 in 0 : vector<8x256xf32>, vector<8x256xf32>, vector<8x256xf32>, vector<8x256xf32>, vector<8x256xf32>, vector<8x256xf32>, vector<8x256xf32>, vector<8x256xf32>, vector<8x256xf32> -> vector<72x256xf32>
    %78 = arith.mulf %77, %2 : vector<72x256xf32>
    %cst_44 = arith.constant dense<0.000000e+00> : vector<8x256xf32>
    %79 = tpu.matmul %0, %78, %cst_44 {dimension_numbers = #tpu.dot_dimension_numbers<[1], [0], [0], [1], [0, 0, 1, 1], [], []>} : vector<8x72xf32>, vector<72x256xf32>, vector<8x256xf32> -> vector<8x256xf32>
    %cst_45 = arith.constant dense<0.000000e+00> : vector<8xf32>
    %80 = vector.multi_reduction <add>, %79, %cst_45 [1] : vector<8x256xf32> to vector<8xf32>
    %81 = vector.shape_cast %80 : vector<8xf32> to vector<8x1xf32>
    %cst_46 = arith.constant 2.560000e+02 : f32
    %82 = vector.broadcast %cst_46 : f32 to vector<8x1xf32>
    %83 = arith.divf %81, %82 : vector<8x1xf32>
    %84 = vector.broadcast %83 : vector<8x1xf32> to vector<8x256xf32>
    %85 = arith.subf %79, %84 : vector<8x256xf32>
    %86 = arith.mulf %85, %85 : vector<8x256xf32>
    %cst_47 = arith.constant dense<0.000000e+00> : vector<8xf32>
    %87 = vector.multi_reduction <add>, %86, %cst_47 [1] : vector<8x256xf32> to vector<8xf32>
    %88 = vector.shape_cast %87 : vector<8xf32> to vector<8x1xf32>
    %cst_48 = arith.constant 2.560000e+02 : f32
    %89 = vector.broadcast %cst_48 : f32 to vector<8x1xf32>
    %90 = arith.divf %88, %89 : vector<8x1xf32>
    %cst_49 = arith.constant 9.99999974E-6 : f32
    %91 = vector.broadcast %cst_49 : f32 to vector<8x1xf32>
    %92 = arith.addf %90, %91 : vector<8x1xf32>
    %93 = math.rsqrt %92 : vector<8x1xf32>
    %94 = vector.broadcast %93 : vector<8x1xf32> to vector<8x256xf32>
    %95 = arith.mulf %85, %94 : vector<8x256xf32>
    %cst_50 = arith.constant 0.000000e+00 : f32
    %96 = vector.broadcast %cst_50 : f32 to vector<8x256xf32>
    %97 = arith.maximumf %95, %96 : vector<8x256xf32>
    %c17_i32_51 = arith.constant 17 : i32
    %98 = tpu.dynamic_rotate %97 by %c17_i32_51 dim 1 : vector<8x256xf32>, i32 -> vector<8x256xf32>
    %c16_i32_52 = arith.constant 16 : i32
    %99 = tpu.dynamic_rotate %97 by %c16_i32_52 dim 1 : vector<8x256xf32>, i32 -> vector<8x256xf32>
    %c15_i32_53 = arith.constant 15 : i32
    %100 = tpu.dynamic_rotate %97 by %c15_i32_53 dim 1 : vector<8x256xf32>, i32 -> vector<8x256xf32>
    %c1_i32_54 = arith.constant 1 : i32
    %101 = tpu.dynamic_rotate %97 by %c1_i32_54 dim 1 : vector<8x256xf32>, i32 -> vector<8x256xf32>
    %c255_i32_55 = arith.constant 255 : i32
    %102 = tpu.dynamic_rotate %97 by %c255_i32_55 dim 1 : vector<8x256xf32>, i32 -> vector<8x256xf32>
    %c241_i32_56 = arith.constant 241 : i32
    %103 = tpu.dynamic_rotate %97 by %c241_i32_56 dim 1 : vector<8x256xf32>, i32 -> vector<8x256xf32>
    %c240_i32_57 = arith.constant 240 : i32
    %104 = tpu.dynamic_rotate %97 by %c240_i32_57 dim 1 : vector<8x256xf32>, i32 -> vector<8x256xf32>
    %c239_i32_58 = arith.constant 239 : i32
    %105 = tpu.dynamic_rotate %97 by %c239_i32_58 dim 1 : vector<8x256xf32>, i32 -> vector<8x256xf32>
    %106 = tpu.concatenate %98, %99, %100, %101, %97, %102, %103, %104, %105 in 0 : vector<8x256xf32>, vector<8x256xf32>, vector<8x256xf32>, vector<8x256xf32>, vector<8x256xf32>, vector<8x256xf32>, vector<8x256xf32>, vector<8x256xf32>, vector<8x256xf32> -> vector<72x256xf32>
    %107 = arith.mulf %106, %3 : vector<72x256xf32>
    %cst_59 = arith.constant dense<0.000000e+00> : vector<8x256xf32>
    %108 = tpu.matmul %1, %107, %cst_59 {dimension_numbers = #tpu.dot_dimension_numbers<[1], [0], [0], [1], [0, 0, 1, 1], [], []>} : vector<8x72xf32>, vector<72x256xf32>, vector<8x256xf32> -> vector<8x256xf32>
    %cst_60 = arith.constant dense<0.000000e+00> : vector<8xf32>
    %109 = vector.multi_reduction <add>, %108, %cst_60 [1] : vector<8x256xf32> to vector<8xf32>
    %110 = vector.shape_cast %109 : vector<8xf32> to vector<8x1xf32>
    %cst_61 = arith.constant 2.560000e+02 : f32
    %111 = vector.broadcast %cst_61 : f32 to vector<8x1xf32>
    %112 = arith.divf %110, %111 : vector<8x1xf32>
    %113 = vector.broadcast %112 : vector<8x1xf32> to vector<8x256xf32>
    %114 = arith.subf %108, %113 : vector<8x256xf32>
    %115 = arith.mulf %114, %114 : vector<8x256xf32>
    %cst_62 = arith.constant dense<0.000000e+00> : vector<8xf32>
    %116 = vector.multi_reduction <add>, %115, %cst_62 [1] : vector<8x256xf32> to vector<8xf32>
    %117 = vector.shape_cast %116 : vector<8xf32> to vector<8x1xf32>
    %cst_63 = arith.constant 2.560000e+02 : f32
    %118 = vector.broadcast %cst_63 : f32 to vector<8x1xf32>
    %119 = arith.divf %117, %118 : vector<8x1xf32>
    %cst_64 = arith.constant 9.99999974E-6 : f32
    %120 = vector.broadcast %cst_64 : f32 to vector<8x1xf32>
    %121 = arith.addf %119, %120 : vector<8x1xf32>
    %122 = math.rsqrt %121 : vector<8x1xf32>
    %123 = vector.broadcast %122 : vector<8x1xf32> to vector<8x256xf32>
    %124 = arith.mulf %114, %123 : vector<8x256xf32>
    %cst_65 = arith.constant 0.000000e+00 : f32
    %125 = vector.broadcast %cst_65 : f32 to vector<8x256xf32>
    %126 = arith.maximumf %124, %125 : vector<8x256xf32>
    %c1_66 = arith.constant 1 : index
    %c0_67 = arith.constant 0 : index
    %c0_68 = arith.constant 0 : index
    %127 = vector.load %arg6[%c1_66, %c0_67, %c0_68] : memref<2x8x256xf32, #tpu.memory_space<vmem>>, vector<1x8x256xf32>
    %128 = vector.shape_cast %127 : vector<1x8x256xf32> to vector<8x256xf32>
    %129 = vector.shape_cast %126 : vector<8x256xf32> to vector<1x8x256xf32>
    tpu.vector_store %arg6[%c1_66, %c0_67, %c0_68], %129 {strides = array<i32>} : memref<2x8x256xf32, #tpu.memory_space<vmem>>, vector<1x8x256xf32>,
    return
  }
  func.func @transform_0(%arg0: i32) -> (i32, i32, i32) {
    %c0_i32 = arith.constant 0 : i32
    %c0_i32_0 = arith.constant 0 : i32
    %c0_i32_1 = arith.constant 0 : i32
    return %arg0, %c0_i32, %c0_i32_0 : i32, i32, i32
  }
  func.func @transform_1(%arg0: i32) -> (i32, i32) {
    %c0_i32 = arith.constant 0 : i32
    %c0_i32_0 = arith.constant 0 : i32
    %c0_i32_1 = arith.constant 0 : i32
    return %c0_i32, %c0_i32_0 : i32, i32
  }
  func.func @transform_2(%arg0: i32) -> (i32, i32) {
    %c0_i32 = arith.constant 0 : i32
    %c0_i32_0 = arith.constant 0 : i32
    %c0_i32_1 = arith.constant 0 : i32
    return %c0_i32, %c0_i32_0 : i32, i32
  }
  func.func @transform_3(%arg0: i32) -> (i32, i32) {
    %c0_i32 = arith.constant 0 : i32
    %c0_i32_0 = arith.constant 0 : i32
    %c0_i32_1 = arith.constant 0 : i32
    return %c0_i32, %c0_i32_0 : i32, i32
  }
  func.func @transform_4(%arg0: i32) -> (i32, i32) {
    %c0_i32 = arith.constant 0 : i32
    %c0_i32_0 = arith.constant 0 : i32
    %c0_i32_1 = arith.constant 0 : i32
    return %c0_i32, %c0_i32_0 : i32, i32
  }
  func.func @transform_5(%arg0: i32) -> (i32, i32, i32) {
    %c0_i32 = arith.constant 0 : i32
    %c0_i32_0 = arith.constant 0 : i32
    %c0_i32_1 = arith.constant 0 : i32
    return %arg0, %c0_i32, %c0_i32_0 : i32, i32, i32
  }
}

</mosaic_0001>

<bundles_post_ra>
// kernel: tpu_custom_call.1
= control target key start
LH: loop header
LB: loop body
LE: loop exit
PB: predicated region body
PF: predicated region fallthrough
CT: control target
= control target key end

     0   :  { %10 = vsyncpa [#allocation3], 0  ;;  %s2325_s0 = inlined_call_operand.hbm [shape: f32[4,8,256], index: 0, kind: input, shape index: {}]   ;;  %s2326_s1 = inlined_call_operand.hbm [shape: f32[8,72], index: 1, kind: input, shape index: {}]   ;;  %s2327_s2 = inlined_call_operand.hbm [shape: f32[8,72], index: 2, kind: input, shape index: {}]   ;;  %s2328_s3 = inlined_call_operand.hbm [shape: f32[72,256], index: 3, kind: input, shape index: {}]   ;;  %s2329_s4 = inlined_call_operand.hbm [shape: f32[72,256], index: 4, kind: input, shape index: {}]   ;;  %s2330_s5 = inlined_call_operand.hbm [shape: f32[4,8,256], index: 5, kind: output, shape index: {}]  }
   0x1   :  { %12 = vsyncpa [#allocation3 + $0x1], 0 }
   0x2   :  { %13 = vsyncpa [#allocation6], 0 }
   0x3   :  { %14 = vsyncpa [#allocation9], 0 }
   0x4   :  { %15 = vsyncpa [#allocation4], 0 }
   0x5   :  { %17 = vsyncpa [#allocation4 + $0x1], 0  ;;  %s1585_s18 = smov 0   ;;  %s1587_s19 = smov 0  }
   0x6   :  { %s1589_s20 = smov 0   ;;  %s1591_s21 = smov 0  }
   0x7 LB: > { %s1606_s22 = sadd.s32 4294967295, %s1535_s21   ;;  %s1112_s23 = sadd.s32 4294967294, %s1535_s21   ;;  %s1535_s21 = sphi %s1591_s21, %s2353_s21   ;;  %s1531_s20 = sphi %s1589_s20, %s2352_s20   ;;  %s1527_s19 = sphi %s1587_s19, %s2351_s19   ;;  %s1523_s18 = sphi %s1585_s18, %s2350_s18  }
   0x8   : > { %p43_p0 = scmp.ne.s32.totalorder %s1527_s19, %s1523_s18  ;;  %p2331_p1 = scmp.eq.s32.totalorder %s1606_s22, 0 }
   0x9   : > { %p157_p3 = scmp.eq.s32.totalorder %s1112_s23, 1  ;;  %p1113_p5 = scmp.ge.s32.totalorder %s1535_s21, 1 }
   0xa   : > { %p1615_p4 = por %p2331_p1, %p43_p0  ;;  %p164_p7 = scmp.lt.s32.totalorder %s1535_s21, 3 }
   0xb   : > { %p1620_p6 = por %p157_p3, %p43_p0  ;;  %s1537_s27 = smov [#allocation5]  }
   0xc   : > { %s2334_s24 = scalar_select %p1615_p4, 1, 0 }
   0xd   : > { %s2335_s25 = scalar_select %p1620_p6, 1, 0 }
   0xe   : > { %p1625_p8 = pnand %p1113_p5, %p164_p7  ;;  %s177_s28 = sshll.u32 %s1537_s27, 4  ;;  %s178_s28 = int_to_ptr.vmem [resolvable:$true] %s177_s28 }
   0xf   : > { %s1538_s29 = smov [#allocation8]   ;;  %s1539_s7 = smov [#allocation7]  }
  0x10   : > { %s2336_s26 = scalar_select %p1625_p8, 1, 0 }
  0x11   : > { %p1232_p10 = pneg %p1625_p8  ;;  %s198_s30 = sshll.u32 %s1538_s29, 4  ;;  %s1638_s30 = int_to_ptr.vmem [resolvable:$true] %s198_s30 }
  0x12   : > { %s1640_s8 = sshll.u32 %s1539_s7, 4  ;;  %s1319_s11 = scalar_lea.hbm %s2326_s1, 128  ;;  %s189_s8 = int_to_ptr.vmem [resolvable:$true] %s1640_s8 }
  0x13   : > { %p1634_p11 = pnand %p1232_p10, %p2331_p1  ;;  %p1320_p12 = scmp.ne.s32.totalorder %s2326_s1, %s1319_s11 }
  0x14   : > { %p1326_p5 = scmp.lt.u32.totalorder %s1319_s11, %s2326_s1 }
  0x15   : > { %p1650_p13 = pneg %p1634_p11 }
  0x17   : > { %p1322_p0 = pnand %p1650_p13, %p1320_p12 }
  0x19   : > { %p1323_p3 = pneg %p1322_p0 }
  0x1b   : > { %p1328_p7 = pnand %p1326_p5, %p1323_p3 }
  0x1d   : > { %1331 = shalt.err (!%p1328_p7)
}
  0x1e   : > { %s1332_s17 = scalar_lea.vmem %s178_s28, 128  ;;  %p1340_p2 = scmp.lt.s32.totalorder %s178_s28, %s178_s28 }
  0x1f   : > { %p1333_p10 = scmp.ne.s32.totalorder %s178_s28, %s1332_s17  ;;  %p1341_p6 = scmp.lt.s32.totalorder %s1332_s17, %s1332_s17 }
  0x21   : > { %p1335_p9 = pnand %p1333_p10, %p1650_p13  ;;  %p1342_p4 = por %p1341_p6, %p1340_p2 }
  0x23   : > { %p1336_p1 = pneg %p1335_p9 }
  0x25   : > { %p1343_p8 = pnand %p1342_p4, %p1336_p1 }
  0x27   : > { %1346 = shalt.err (!%p1343_p8)
}
  0x28   : > { %1235 = dma.hbm_to_vmem [thread:$0]  (!%p1634_p11), %s2326_s1, 128, %s178_s28, [#allocation6]  }
  0x29   : > { %s1347_s9 = scalar_lea.hbm %s2328_s3, 2304 }
  0x2a   : > { %p1348_p9 = scmp.ne.s32.totalorder %s2328_s3, %s1347_s9  ;;  %p1354_p1 = scmp.lt.u32.totalorder %s1347_s9, %s2328_s3 }
  0x2c   : > { %p1350_p12 = pnand %p1348_p9, %p1650_p13 }
  0x2e   : > { %p1351_p2 = pneg %p1350_p12 }
  0x30   : > { %p1356_p4 = pnand %p1354_p1, %p1351_p2 }
  0x32   : > { %1359 = shalt.err (!%p1356_p4)
}
  0x33   : > { %s1360_s28 = scalar_lea.vmem %s1638_s30, 2304  ;;  %p1368_p3 = scmp.lt.s32.totalorder %s1638_s30, %s1638_s30 }
  0x34   : > { %p1361_p6 = scmp.ne.s32.totalorder %s1638_s30, %s1360_s28  ;;  %p1369_p5 = scmp.lt.s32.totalorder %s1360_s28, %s1360_s28 }
  0x36   : > { %p1363_p8 = pnand %p1361_p6, %p1650_p13  ;;  %p1370_p7 = por %p1369_p5, %p1368_p3 }
  0x38   : > { %p1364_p0 = pneg %p1363_p8 }
  0x3a   : > { %p1371_p10 = pnand %p1370_p7, %p1364_p0 }
  0x3c   : > { %1374 = shalt.err (!%p1371_p10)
}
  0x3d   : > { %s1540_s15 = smov 256   ;;  %s1541_s16 = smov 16  }
  0x3e   : > { %1241 = dma.hbm_to_vmem [thread:$0]  (!%p1634_p11), %s2328_s3, 2304, %s1638_s30, [#allocation9], %s1540_s15, %s1540_s15, %s1541_s16  }
  0x3f   : > { %s1375_s7 = scalar_lea.hbm %s2327_s2, 128 }
  0x40   : > { %p1376_p9 = scmp.ne.s32.totalorder %s2327_s2, %s1375_s7  ;;  %p1382_p1 = scmp.lt.u32.totalorder %s1375_s7, %s2327_s2 }
  0x42   : > { %p1378_p12 = pnand %p1376_p9, %p1650_p13 }
  0x44   : > { %p1379_p2 = pneg %p1378_p12 }
  0x46   : > { %p1384_p4 = pnand %p1382_p1, %p1379_p2 }
  0x48   : > { %1387 = shalt.err (!%p1384_p4)
}
  0x49   : > { %s1388_s13 = scalar_lea.vmem %s189_s8, 128  ;;  %p1396_p3 = scmp.lt.s32.totalorder %s189_s8, %s189_s8 }
  0x4a   : > { %p1389_p6 = scmp.ne.s32.totalorder %s189_s8, %s1388_s13  ;;  %p1397_p5 = scmp.lt.s32.totalorder %s1388_s13, %s1388_s13 }
  0x4c   : > { %p1391_p8 = pnand %p1389_p6, %p1650_p13  ;;  %p1398_p7 = por %p1397_p5, %p1396_p3 }
  0x4e   : > { %p1392_p0 = pneg %p1391_p8 }
  0x50   : > { %p1399_p10 = pnand %p1398_p7, %p1392_p0 }
  0x52   : > { %1402 = shalt.err (!%p1399_p10)
}
  0x53   : > { %1238 = dma.hbm_to_vmem [thread:$0]  (!%p1634_p11), %s2327_s2, 128, %s189_s8, [#allocation6]  }
  0x54   : > { %s1542_s17 = smov [#allocation10]   ;;  %s1403_s7 = scalar_lea.hbm %s2329_s4, 2304 }
  0x55   : > { %s211_s23 = sshll.u32 %s1542_s17, 4  ;;  %p1404_p9 = scmp.ne.s32.totalorder %s2329_s4, %s1403_s7  ;;  %s212_s23 = int_to_ptr.vmem [resolvable:$true] %s211_s23 }
  0x56   : > { %p1410_p1 = scmp.lt.u32.totalorder %s1403_s7, %s2329_s4 }
  0x57   : > { %p1406_p12 = pnand %p1404_p9, %p1650_p13 }
  0x59   : > { %p1407_p2 = pneg %p1406_p12 }
  0x5b   : > { %p1412_p4 = pnand %p1410_p1, %p1407_p2 }
  0x5d   : > { %1415 = shalt.err (!%p1412_p4)
}
  0x5e   : > { %s1416_s8 = scalar_lea.vmem %s212_s23, 2304  ;;  %p1424_p3 = scmp.lt.s32.totalorder %s212_s23, %s212_s23 }
  0x5f   : > { %p1417_p6 = scmp.ne.s32.totalorder %s212_s23, %s1416_s8  ;;  %p1425_p5 = scmp.lt.s32.totalorder %s1416_s8, %s1416_s8 }
  0x61   : > { %p1419_p8 = pnand %p1417_p6, %p1650_p13  ;;  %p1426_p7 = por %p1425_p5, %p1424_p3 }
  0x63   : > { %p1420_p0 = pneg %p1419_p8 }
  0x65   : > { %p1427_p10 = pnand %p1426_p7, %p1420_p0 }
  0x67   : > { %1430 = shalt.err (!%p1427_p10)
}
  0x68   : > { %1244 = dma.hbm_to_vmem [thread:$0]  (!%p1634_p11), %s2329_s4, 2304, %s212_s23, [#allocation9], %s1540_s15, %s1540_s15, %s1541_s16  }
  0x69   : > { %s1733_s14 = sadd.s32 1, %s1535_s21   ;;  %s30_s6 = sadd.s32 1, %s1531_s20 }
  0x6a   : > { %s27_s28 = ssub.s32 %s1535_s21, %s1733_s14  ;;  %p37_p13 = scmp.ne.s32.totalorder %s1531_s20, %s1527_s19 }
  0x6b   : > { %p28_p9 = scmp.eq.s32.totalorder %s27_s28, 0  ;;  %p38_p12 = scmp.eq.s32.totalorder %s1535_s21, 0 }
  0x6c   : > { %p2339_p2 = scmp.eq.s32.totalorder %s1606_s22, 1  ;;  %p1257_p4 = scmp.lt.s32.totalorder %s1535_s21, 2 }
  0x6d   : > { %s1749_s27 = scalar_select %p28_p9, %s1531_s20, %s30_s6  }
  0x6e   : > { %p1743_p1 = por %p2339_p2, %p37_p13  ;;  %p39_p6 = por %p38_p12, %p37_p13 }
  0x6f   : > { %s225_s29 = sand.u32 1, %s1531_s20   ;;  %s1145_s23 = sshll.u32 %s1535_s21, 9 }
  0x70   : > { %s1119_s7 = sshll.u32 %s225_s29, 5  ;;  %s1756_s11 = scalar_lea.hbm %s2325_s0, %s1145_s23 }
  0x71   : > { %s229_s12 = scalar_lea.vmem [#allocation2], %s1119_s7  ;;  %p1760_p11 = pnand %p1257_p4, %p39_p6 }
  0x72   : > { %s237_s8 = sshll.u32 %s229_s12, 4  ;;  %s1764_s30 = scalar_lea.sflag [#allocation3], %s225_s29  ;;  %s1758_s8 = int_to_ptr.vmem [resolvable:$true] %s237_s8 }
  0x73   : > { %s1431_s6 = scalar_lea.hbm %s1756_s11, 512  ;;  %p1433_p0 = pneg %p1760_p11 }
  0x74   : > { %p1432_p8 = scmp.ne.s32.totalorder %s1756_s11, %s1431_s6  ;;  %s1436_s23 = scalar_lea.hbm %s2325_s0, 1024 }
  0x75   : > { %p1437_p7 = scmp.lt.u32.totalorder %s1756_s11, %s2325_s0  ;;  %p1438_p10 = scmp.lt.u32.totalorder %s1436_s23, %s1431_s6 }
  0x76   : > { %p1434_p3 = pnand %p1433_p0, %p1432_p8  ;;  %p1440_p9 = scmp.lt.u32.totalorder %s1431_s6, %s1756_s11 }
  0x77   : > { %p1439_p13 = por %p1438_p10, %p1437_p7 }
  0x78   : > { %p1435_p5 = pneg %p1434_p3 }
  0x79   : > { %p1441_p12 = por %p1440_p9, %p1439_p13 }
  0x7b   : > { %p1442_p2 = pnand %p1441_p12, %p1435_p5 }
  0x7d   : > { %1445 = shalt.err (!%p1442_p2)
}
  0x7e   : > { %s1446_s29 = scalar_lea.vmem %s1758_s8, 512  ;;  %s1543_s12 = smov [#allocation2]  }
  0x7f   : > { %p1447_p4 = scmp.ne.s32.totalorder %s1758_s8, %s1446_s29  ;;  %s1451_s28 = sshll.u32 %s1543_s12, 4  ;;  %s1452_s28 = int_to_ptr.vmem [resolvable:$false] %s1451_s28 }
  0x80   : > { %s1453_s7 = scalar_lea.vmem %s1452_s28, 1024  ;;  %p1454_p3 = scmp.lt.s32.totalorder %s1758_s8, %s1452_s28 }
  0x81   : > { %p1449_p6 = pnand %p1447_p4, %p1433_p0  ;;  %p1455_p7 = scmp.lt.s32.totalorder %s1453_s7, %s1446_s29 }
  0x83   : > { %p1450_p8 = pneg %p1449_p6  ;;  %p1456_p10 = por %p1455_p7, %p1454_p3 }
  0x85   : > { %p1457_p13 = pnand %p1456_p10, %p1450_p8 }
  0x87   : > { %1460 = shalt.err (!%p1457_p13)
}
  0x88   : > { %1248 = dma.hbm_to_vmem [thread:$0]  (!%p1760_p11), %s1756_s11, 512, %s1758_s8, %s1764_s30, %s1540_s15, %s1540_s15, %s1541_s16  }
  0x89   : > { %p2342_p0 = scmp.ne.s32.totalorder %s2336_s26, 0 }
  0x8a   : > { %s1798_s6 = sand.u32 (!%p2342_p0), 1, %s1527_s19   ;;  %p2343_p5 = scmp.ne.s32.totalorder (!%p2342_p0), %s2334_s24, 0 }
  0x8b   : > { %249 = sbr.rel (%p2342_p0) target bundleno = 1558 (0x616), region = 40  ;;  %s1124_s23 = sshll.u32 (!%p2342_p0), %s1798_s6, 5 }
  0x8c   : > { %s252_s9 = scalar_lea.sflag (!%p2342_p0), [#allocation3], %s1798_s6  ;;  %s1804_s13 = scalar_lea.vmem (!%p2342_p0), [#allocation2], %s1124_s23 }
  0x92   : > { %1506 = dma.done.wait (%p2343_p5), %s252_s9, 512  }
  0x93   : > { %1508 = vsyncadd (%p2343_p5), %s252_s9, 4294966784  ;;  %p2344_p11 = scmp.eq.s32.totalorder %s1606_s22, 0 }
  0x95   : > { %1510 = dma.done.wait (%p2344_p11), [#allocation6], 256   ;;  %p2345_p9 = pmov %p2344_p11 }
  0x97   : > { %1512 = vsyncadd (%p2345_p9), [#allocation6], 4294967040  ;;  %p2346_p12 = pmov %p2345_p9 }
  0x98   : > { %p2347_p2 = pmov %p2345_p9 }
  0x99   : > { %1514 = dma.done.wait (%p2346_p12), [#allocation9], 4608  }
  0x9a   : > { %1516 = vsyncadd (%p2347_p2), [#allocation9], 4294962688  ;;  %v1819_v0 = vld [vmem:[%s1804_s13] sm:$0xff]  ;;  %s1544_s26 = smov 16   ;;  %s1545_s24 = smov 17   ;;  %v1826_v1 = vld [vmem:[%s1804_s13 + $0x8] sm:$0xff]  ;;  %v344_v5 = vlaneseq }
  0x9b   : > { %349 = vrot.lane.b32.xlu1 %v1819_v0, %s1544_s26  ;;  %340 = vrot.lane.b32.xlu0 %v1819_v0, %s1545_s24  ;;  %s1546_s15 = smov 15   ;;  %s1547_s16 = smov 1   ;;  %v1550_v2 = vmov 0.0   ;;  %v1859_v3 = vld [vmem:[%s1804_s13 + $0x18] sm:$0xff]  ;;  %v1862_v4 = vld [vmem:[%s1804_s13 + $0x10] sm:$0xff]  ;;  %v1899_v9 = vld [vmem:[#allocation8 + $0x10] sm:$0xff] }
  0x9c   : > { %s1548_s11 = smov 127   ;;  %s1549_s8 = smov 113   ;;  %484 = vmatprep.mubr.f32.mxu0 %v1550_v2  ;;  %643 = vmatprep.mubr.f32.mxu1 %v1550_v2  ;;  %v1896_v6 = vand.u32 127, %v344_v5  ;;  %v1902_v10 = vld [vmem:[#allocation8] sm:$0xff]  ;;  %v1904_v11 = vld [vmem:[#allocation8 + $0x8] sm:$0xff]  ;;  %v1906_v12 = vld [vmem:[#allocation8 + $0x18] sm:$0xff] }
  0x9d   : > { %s1551_s30 = smov 112   ;;  %s1552_s10 = smov 111   ;;  %v1921_v27 = vld [vmem:[#allocation8 + $0x20] sm:$0xff]  ;;  %v1924_v28 = vld [vmem:[#allocation8 + $0x28] sm:$0xff]  ;;  %v1930_v31 = vld [vmem:[#allocation8 + $0x30] sm:$0xff]  ;;  %vm416_vm8 = vcmask 588800  }
  0x9e   : > { %vm353_vm0 = vcmp.lt.s32.totalorder %v1896_v6, 16  ;;  %vm346_vm1 = vcmp.lt.s32.totalorder %v1896_v6, 17  ;;  %vm360_vm2 = vcmp.lt.s32.totalorder %v1896_v6, 15  ;;  %vm367_vm3 = vcmp.lt.s32.totalorder %v1896_v6, 1  ;;  %v1932_v32 = vld [vmem:[#allocation8 + $0x38] sm:$0xff]  ;;  %v1939_v37 = vld [vmem:[#allocation8 + $0x48] sm:$0xff] }
  0x9f   : > { %351 = vrot.lane.b32.xlu1 %v1826_v1, %s1544_s26  ;;  %342 = vrot.lane.b32.xlu0 %v1826_v1, %s1545_s24  ;;  %vm374_vm4 = vcmp.lt.s32.totalorder %v1896_v6, 127  ;;  %v1941_v38 = vld [vmem:[#allocation8 + $0x40] sm:$0xff]  ;;  %v1947_v43 = vld [vmem:[#allocation8 + $0x50] sm:$0xff]  ;;  %v1949_v44 = vld [vmem:[#allocation8 + $0x58] sm:$0xff]  ;;  %v407_v49 = vmul.f32 %v1826_v1, %v1939_v37  ;;  %vm381_vm5 = vcmp.lt.s32.totalorder %v1896_v6, 113  ;;  %vm388_vm6 = vcmp.lt.s32.totalorder %v1896_v6, 112 }
  0xa0   : > { %v406_v50 = vmul.f32 %v1819_v0, %v1941_v38  ;;  %v1962_v59 = vld [vmem:[#allocation8 + $0x60] sm:$0xff]  ;;  %v1965_v60 = vld [vmem:[#allocation8 + $0x68] sm:$0xff]  ;;  %v1971_v63 = vld [vmem:[#allocation8 + $0x70] sm:$0xff]  ;;  %vm395_vm7 = vcmp.lt.s32.totalorder %v1896_v6, 111  ;;  %s297_s29 = scalar_lea.vmem [#allocation11], %s1124_s23  ;;  %s1147_s12 = sshll.u32 %s1606_s22, 9 }
  0xa1   : > { %s1001_s28 = sshll.u32 %s297_s29, 4  ;;  %s2278_s13 = scalar_lea.hbm %s2330_s5, %s1147_s12  ;;  %s2280_s28 = int_to_ptr.vmem [resolvable:$true] %s1001_s28 }
  0xa2   : > { %s987_s23 = scalar_lea.sflag [#allocation4], %s1798_s6  ;;  %s1461_s22 = scalar_lea.vmem %s2280_s28, 512 }
  0xa3   : > { %358 = vrot.lane.b32.xlu1 %v1826_v1, %s1546_s15  ;;  %356 = vrot.lane.b32.xlu0 %v1819_v0, %s1546_s15  ;;  %p1462_p4 = scmp.ne.s32.totalorder %s2280_s28, %s1461_s22 }
  0xa5   : > { %p1463_p6 = pnand %p1462_p4, %p1743_p1 }
  0xa7   : > { %365 = vrot.lane.b32.xlu1 %v1826_v1, %s1547_s16  ;;  %363 = vrot.lane.b32.xlu0 %v1819_v0, %s1547_s16  ;;  %p1464_p8 = pneg %p1463_p6 }
  0xab   : > { %372 = vrot.lane.b32.xlu1 %v1826_v1, %s1548_s11  ;;  %370 = vrot.lane.b32.xlu0 %v1819_v0, %s1548_s11 }
  0xaf   : > { %379 = vrot.lane.b32.xlu1 %v1826_v1, %s1549_s8  ;;  %377 = vrot.lane.b32.xlu0 %v1819_v0, %s1549_s8 }
  0xb3   : > { %386 = vrot.lane.b32.xlu1 %v1826_v1, %s1551_s30  ;;  %384 = vrot.lane.b32.xlu0 %v1819_v0, %s1551_s30 }
  0xb7   : > { %393 = vrot.lane.b32.xlu1 %v1826_v1, %s1552_s10  ;;  %391 = vrot.lane.b32.xlu0 %v1819_v0, %s1552_s10  ;;  %v1973_v0 = vld [vmem:[#allocation8 + $0x78] sm:$0xff] }
  0xbb   : > { %675 = vrot.lane.b32.xlu1 %v1859_v3, %s1545_s24  ;;  %673 = vrot.lane.b32.xlu0 %v1862_v4, %s1545_s24 }
  0xbf   : > { %681 = vrot.lane.b32.xlu1 %v1859_v3, %s1544_s26  ;;  %679 = vrot.lane.b32.xlu0 %v1862_v4, %s1544_s26 }
  0xc3   : > { %687 = vrot.lane.b32.xlu1 %v1859_v3, %s1546_s15  ;;  %685 = vrot.lane.b32.xlu0 %v1862_v4, %s1546_s15 }
  0xc7   : > { %693 = vrot.lane.b32.xlu1 %v1859_v3, %s1547_s16  ;;  %691 = vrot.lane.b32.xlu0 %v1862_v4, %s1547_s16 }
  0xcb   : > { %699 = vrot.lane.b32.xlu1 %v1859_v3, %s1548_s11  ;;  %697 = vrot.lane.b32.xlu0 %v1862_v4, %s1548_s11 }
  0xcf   : > { %705 = vrot.lane.b32.xlu1 %v1859_v3, %s1549_s8  ;;  %703 = vrot.lane.b32.xlu0 %v1862_v4, %s1549_s8 }
  0xd3   : > { %711 = vrot.lane.b32.xlu1 %v1859_v3, %s1551_s30  ;;  %709 = vrot.lane.b32.xlu0 %v1862_v4, %s1551_s30 }
  0xd7   : > { %717 = vrot.lane.b32.xlu1 %v1859_v3, %s1552_s10  ;;  %715 = vrot.lane.b32.xlu0 %v1862_v4, %s1552_s10 }
 0x10d   : > { %v350_v7 = vpop.permute.xlu1 %349  ;;  %v341_v8 = vpop.permute.xlu0 %340 }
 0x111   : > { %v352_v13 = vpop.permute.xlu1 %351  ;;  %v343_v14 = vpop.permute.xlu0 %342 }
 0x112   : > { %v354_v15 = vsel %vm353_vm0, %v350_v7, %v352_v13  ;;  %v355_v16 = vsel %vm353_vm0, %v352_v13, %v350_v7  ;;  %v347_v17 = vsel %vm346_vm1, %v341_v8, %v343_v14  ;;  %v348_v18 = vsel %vm346_vm1, %v343_v14, %v341_v8 }
 0x113   : > { %v400_v19 = vmul.f32 %v355_v16, %v1899_v9  ;;  %v398_v20 = vmul.f32 %v348_v18, %v1902_v10  ;;  %v399_v21 = vmul.f32 %v347_v17, %v1904_v11  ;;  %v401_v22 = vmul.f32 %v354_v15, %v1906_v12  ;;  %v1984_v17 = vld [vmem:[#allocation8 + $0x88] sm:$0xff] }
 0x115   : > { %v359_v23 = vpop.permute.xlu1 %358  ;;  %v357_v24 = vpop.permute.xlu0 %356  ;;  %v1148_v25 = vpack.c.bf16 %v401_v22, %v399_v21  ;;  %v1150_v26 = vpack.c.bf16 %v400_v19, %v398_v20  ;;  %v1986_v20 = vld [vmem:[#allocation8 + $0x80] sm:$0xff] }
 0x116   : > { %v361_v29 = vsel %vm360_vm2, %v357_v24, %v359_v23  ;;  %v362_v30 = vsel %vm360_vm2, %v359_v23, %v357_v24 }
 0x117   : > { %1149 = vmatprep.subr.bf16.mxu0 %v1148_v25  ;;  %v402_v39 = vmul.f32 %v362_v30, %v1921_v27  ;;  %v403_v40 = vmul.f32 %v361_v29, %v1924_v28 }
 0x118   : > { %1151 = vmatpush1.bf16.msra.mxu0 %v1150_v26 }
 0x119   : > { %v366_v33 = vpop.permute.xlu1 %365  ;;  %v364_v34 = vpop.permute.xlu0 %363 }
 0x11a   : > { %v368_v35 = vsel %vm367_vm3, %v364_v34, %v366_v33  ;;  %v369_v36 = vsel %vm367_vm3, %v366_v33, %v364_v34 }
 0x11b   : > { %v404_v41 = vmul.f32 %v369_v36, %v1930_v31  ;;  %v405_v42 = vmul.f32 %v368_v35, %v1932_v32  ;;  %v1998_v35 = vld [vmem:[#allocation5] sm:$0xff] }
 0x11d   : > { %v373_v45 = vpop.permute.xlu1 %372  ;;  %v371_v46 = vpop.permute.xlu0 %370  ;;  %v1152_v47 = vpack.c.bf16 %v405_v42, %v403_v40  ;;  %v1154_v48 = vpack.c.bf16 %v404_v41, %v402_v39 }
 0x11e   : > { %v375_v51 = vsel %vm374_vm4, %v371_v46, %v373_v45  ;;  %v376_v52 = vsel %vm374_vm4, %v373_v45, %v371_v46 }
 0x11f   : > { %v408_v53 = vmul.f32 %v375_v51, %v1947_v43  ;;  %v409_v54 = vmul.f32 %v376_v52, %v1949_v44  ;;  %1153 = vmatprep.subr.bf16.mxu0 %v1152_v47 }
 0x120   : > { %1155 = vmatpush1.bf16.msra.mxu0 %v1154_v48 }
 0x121   : > { %v380_v55 = vpop.permute.xlu1 %379  ;;  %v378_v56 = vpop.permute.xlu0 %377  ;;  %v1156_v57 = vpack.c.bf16 %v409_v54, %v407_v49  ;;  %v1158_v58 = vpack.c.bf16 %v408_v53, %v406_v50 }
 0x122   : > { %v382_v61 = vsel %vm381_vm5, %v378_v56, %v380_v55  ;;  %v383_v62 = vsel %vm381_vm5, %v380_v55, %v378_v56 }
 0x123   : > { %1157 = vmatprep.subr.bf16.mxu0 %v1156_v57  ;;  %v410_v13 = vmul.f32 %v382_v61, %v1962_v59  ;;  %v411_v14 = vmul.f32 %v383_v62, %v1965_v60 }
 0x124   : > { %1159 = vmatpush1.bf16.msra.mxu0 %v1158_v58 }
 0x125   : > { %v387_v1 = vpop.permute.xlu1 %386  ;;  %v385_v5 = vpop.permute.xlu0 %384 }
 0x126   : > { %v389_v7 = vsel %vm388_vm6, %v385_v5, %v387_v1  ;;  %v390_v8 = vsel %vm388_vm6, %v387_v1, %v385_v5 }
 0x127   : > { %v412_v15 = vmul.f32 %v389_v7, %v1971_v63  ;;  %v413_v16 = vmul.f32 %v390_v8, %v1973_v0 }
 0x129   : > { %v394_v18 = vpop.permute.xlu1 %393  ;;  %v392_v19 = vpop.permute.xlu0 %391  ;;  %v1160_v21 = vpack.c.bf16 %v413_v16, %v411_v14  ;;  %v1162_v22 = vpack.c.bf16 %v412_v15, %v410_v13 }
 0x12a   : > { %v396_v23 = vsel %vm395_vm7, %v392_v19, %v394_v18  ;;  %v397_v24 = vsel %vm395_vm7, %v394_v18, %v392_v19 }
 0x12b   : > { %v415_v25 = vmul.f32 %v397_v24, %v1984_v17  ;;  %1161 = vmatprep.subr.bf16.mxu0 %v1160_v21  ;;  %v414_v26 = vmul.f32 %v396_v23, %v1986_v20 }
 0x12c   : > { %1163 = vmatpush1.bf16.msra.mxu0 %v1162_v22 }
 0x12d   : > { %v676_v29 = vpop.permute.xlu1 %675  ;;  %v674_v30 = vpop.permute.xlu0 %673  ;;  %436 = vmatprep.subr.mxu0 %v415_v25 }
 0x12e   : > { %v677_v33 = vsel %vm346_vm1, %v674_v30, %v676_v29  ;;  %v678_v34 = vsel %vm346_vm1, %v676_v29, %v674_v30 }
 0x12f   : > { %v721_v36 = vmul.f32 %v678_v34, %v1902_v10  ;;  %v722_v39 = vmul.f32 %v677_v33, %v1904_v11 }
 0x130   : > { %437 = vmatpush1.msra.mxu0 %v414_v26 }
 0x131   : > { %v682_v40 = vpop.permute.xlu1 %681  ;;  %v680_v41 = vpop.permute.xlu0 %679  ;;  %1130 = vmatmul.mubr.msk.f32.vlgmr.msra.gmra.mrb[0].mxu0 %vm416_vm8, %v1998_v35 }
 0x132   : > { %v683_v42 = vsel %vm353_vm0, %v680_v41, %v682_v40  ;;  %v684_v45 = vsel %vm353_vm0, %v682_v40, %v680_v41  ;;  %803 = vmatprep.mubr.f32.mxu0 %v1550_v2 }
 0x133   : > { %v723_v46 = vmul.f32 %v684_v45, %v1899_v9  ;;  %v724_v47 = vmul.f32 %v683_v42, %v1906_v12 }
 0x135   : > { %v1182_v10 = vpack.c.bf16 %v723_v46, %v721_v36  ;;  %v688_v48 = vpop.permute.xlu1 %687  ;;  %v686_v11 = vpop.permute.xlu0 %685  ;;  %v1180_v49 = vpack.c.bf16 %v724_v47, %v722_v39 }
 0x136   : > { %v689_v50 = vsel %vm360_vm2, %v686_v11, %v688_v48  ;;  %v690_v51 = vsel %vm360_vm2, %v688_v48, %v686_v11 }
 0x137   : > { %1181 = vmatprep.subr.bf16.mxu0 %v1180_v49  ;;  %v725_v52 = vmul.f32 %v690_v51, %v1921_v27  ;;  %v726_v53 = vmul.f32 %v689_v50, %v1924_v28  ;;  %v729_v27 = vmul.f32 %v1862_v4, %v1941_v38  ;;  %v730_v28 = vmul.f32 %v1859_v3, %v1939_v37 }
 0x138   : > { %1183 = vmatpush1.bf16.msra.mxu0 %v1182_v10 }
 0x139   : > { %v694_v54 = vpop.permute.xlu1 %693  ;;  %v692_v9 = vpop.permute.xlu0 %691 }
 0x13a   : > { %v695_v12 = vsel %vm367_vm3, %v692_v9, %v694_v54  ;;  %v696_v55 = vsel %vm367_vm3, %v694_v54, %v692_v9 }
 0x13b   : > { %v727_v56 = vmul.f32 %v696_v55, %v1930_v31  ;;  %v728_v57 = vmul.f32 %v695_v12, %v1932_v32 }
 0x13d   : > { %v1186_v58 = vpack.c.bf16 %v727_v56, %v725_v52  ;;  %v700_v61 = vpop.permute.xlu1 %699  ;;  %v698_v62 = vpop.permute.xlu0 %697  ;;  %v1184_v1 = vpack.c.bf16 %v728_v57, %v726_v53 }
 0x13e   : > { %v701_v5 = vsel %vm374_vm4, %v698_v62, %v700_v61  ;;  %v702_v7 = vsel %vm374_vm4, %v700_v61, %v698_v62 }
 0x13f   : > { %v731_v31 = vmul.f32 %v701_v5, %v1947_v43  ;;  %v732_v32 = vmul.f32 %v702_v7, %v1949_v44  ;;  %1185 = vmatprep.subr.bf16.mxu0 %v1184_v1 }
 0x140   : > { %1187 = vmatpush1.bf16.msra.mxu0 %v1186_v58 }
 0x141   : > { %v1190_v8 = vpack.c.bf16 %v731_v31, %v729_v27  ;;  %v706_v13 = vpop.permute.xlu1 %705  ;;  %v704_v14 = vpop.permute.xlu0 %703  ;;  %v1188_v4 = vpack.c.bf16 %v732_v32, %v730_v28 }
 0x142   : > { %v707_v38 = vsel %vm381_vm5, %v704_v14, %v706_v13  ;;  %v708_v3 = vsel %vm381_vm5, %v706_v13, %v704_v14 }
 0x143   : > { %1189 = vmatprep.subr.bf16.mxu0 %v1188_v4  ;;  %v733_v37 = vmul.f32 %v707_v38, %v1962_v59  ;;  %v734_v43 = vmul.f32 %v708_v3, %v1965_v60  ;;  %v2131_v4 = vld [vmem:[#allocation10 + $0x10] sm:$0xff]  ;;  %v2133_v38 = vld [vmem:[#allocation10 + $0x8] sm:$0xff]  ;;  %v2135_v3 = vld [vmem:[#allocation10 + $0x18] sm:$0xff] }
 0x144   : > { %1191 = vmatpush1.bf16.msra.mxu0 %v1190_v8  ;;  %v2125_v8 = vld [vmem:[#allocation10] sm:$0xff] }
 0x145   : > { %v712_v15 = vpop.permute.xlu1 %711  ;;  %v710_v44 = vpop.permute.xlu0 %709 }
 0x146   : > { %v713_v16 = vsel %vm388_vm6, %v710_v44, %v712_v15  ;;  %v714_v18 = vsel %vm388_vm6, %v712_v15, %v710_v44 }
 0x147   : > { %v735_v19 = vmul.f32 %v713_v16, %v1971_v63  ;;  %v736_v21 = vmul.f32 %v714_v18, %v1973_v0 }
 0x149   : > { %v1194_v22 = vpack.c.bf16 %v735_v19, %v733_v37  ;;  %v718_v23 = vpop.permute.xlu1 %717  ;;  %v716_v24 = vpop.permute.xlu0 %715  ;;  %v1192_v25 = vpack.c.bf16 %v736_v21, %v734_v43 }
 0x14a   : > { %v719_v59 = vsel %vm395_vm7, %v716_v24, %v718_v23  ;;  %v720_v60 = vsel %vm395_vm7, %v718_v23, %v716_v24 }
 0x14b   : > { %v738_v26 = vmul.f32 %v720_v60, %v1984_v17  ;;  %1193 = vmatprep.subr.bf16.mxu0 %v1192_v25  ;;  %v737_v29 = vmul.f32 %v719_v59, %v1986_v20  ;;  %v2145_v59 = vld [vmem:[#allocation10 + $0x20] sm:$0xff]  ;;  %v2147_v60 = vld [vmem:[#allocation10 + $0x28] sm:$0xff] }
 0x14c   : > { %1195 = vmatpush1.bf16.msra.mxu0 %v1194_v22 }
 0x14d   : > { %755 = vmatprep.subr.mxu0 %v738_v26 }
 0x150   : > { %756 = vmatpush1.msra.mxu0 %v737_v29 }
 0x151   : > { %1134 = vmatmul.mubr.msk.f32.vlgmr.msra.gmra.mrb[2].mxu0 %vm416_vm8, %v1998_v35 }
 0x204   : > { %v486_v63 = vpop.f32.mrb[0].mxu0 }
 0x205   : > { %v488_v0 = vpop.f32.mrb[1].mxu0 }
 0x206   : > { %v491_v30 = vadd.f32 %v488_v0, %v486_v63 }
 0x208   : > { %492 = vadd.xlane.f32.xlu0 %v491_v30 }
 0x224   : > { %v805_v33 = vpop.f32.mrb[2].mxu0 }
 0x225   : > { %v807_v34 = vpop.f32.mrb[3].mxu0 }
 0x226   : > { %v810_v36 = vadd.f32 %v807_v34, %v805_v33 }
 0x228   : > { %811 = vadd.xlane.f32.xlu1 %v810_v36 }
 0x295   : > { %v493_v39 = vpop.xlane.xlu0 %492 }
 0x296   : > { %v495_v40 = vmul.f32 0.00390625, %v493_v39 }
 0x298   : > { %v496_v17 = vsub.f32 %v486_v63, %v495_v40  ;;  %v497_v41 = vsub.f32 %v488_v0, %v495_v40  ;;  %v2153_v63 = vld [vmem:[#allocation10 + $0x30] sm:$0xff]  ;;  %v2155_v0 = vld [vmem:[#allocation10 + $0x38] sm:$0xff] }
 0x29a   : > { %v498_v42 = vmul.f32 %v496_v17, %v496_v17  ;;  %v499_v20 = vmul.f32 %v497_v41, %v497_v41 }
 0x29c   : > { %v500_v45 = vadd.f32 %v499_v20, %v498_v42  ;;  %v2165_v42 = vld [vmem:[#allocation10 + $0x48] sm:$0xff]  ;;  %v2167_v20 = vld [vmem:[#allocation10 + $0x50] sm:$0xff] }
 0x29e   : > { %501 = vadd.xlane.f32.xlu0 %v500_v45  ;;  %v2169_v45 = vld [vmem:[#allocation10 + $0x58] sm:$0xff] }
 0x2b5   : > { %v812_v46 = vpop.xlane.xlu1 %811 }
 0x2b6   : > { %v813_v47 = vmul.f32 0.00390625, %v812_v46  ;;  %v2171_v46 = vld [vmem:[#allocation10 + $0x40] sm:$0xff] }
 0x2b8   : > { %v814_v10 = vsub.f32 %v805_v33, %v813_v47  ;;  %v815_v35 = vsub.f32 %v807_v34, %v813_v47 }
 0x2ba   : > { %v816_v48 = vmul.f32 %v814_v10, %v814_v10  ;;  %v817_v11 = vmul.f32 %v815_v35, %v815_v35 }
 0x2bc   : > { %v818_v49 = vadd.f32 %v817_v11, %v816_v48 }
 0x2be   : > { %819 = vadd.xlane.f32.xlu0 %v818_v49 }
 0x32b   : > { %v502_v50 = vpop.xlane.xlu0 %501 }
 0x32c   : > { %v503_v51 = vmul.f32 0.00390625, %v502_v50 }
 0x32e   : > { %v504_v52 = vadd.f32 1e-05, %v503_v51 }
 0x330   : > { %1311 = vrsqrt.f32 %v504_v52 }
 0x33a   : > { %v1312_v53 = vpop.eup %1311 }
 0x33b   : > { %v506_v54 = vmul.f32 %v1312_v53, %v496_v17  ;;  %v507_v9 = vmul.f32 %v1312_v53, %v497_v41 }
 0x33d   : > { %v2053_v12 = vmax.f32 %v506_v54, 0.0  ;;  %v2055_v55 = vmax.f32 %v507_v9, 0.0 }
 0x33f   : > { %512 = vrot.lane.b32.xlu0 %v2055_v55, %s1545_s24  ;;  %510 = vrot.lane.b32.xlu1 %v2053_v12, %s1545_s24  ;;  %v567_v52 = vmul.f32 %v2055_v55, %v2165_v42  ;;  %v566_v53 = vmul.f32 %v2053_v12, %v2171_v46 }
 0x343   : > { %522 = vrot.lane.b32.xlu0 %v2053_v12, %s1546_s15  ;;  %516 = vrot.lane.b32.xlu1 %v2053_v12, %s1544_s26 }
 0x347   : > { %528 = vrot.lane.b32.xlu0 %v2053_v12, %s1547_s16  ;;  %518 = vrot.lane.b32.xlu1 %v2055_v55, %s1544_s26 }
 0x34b   : > { %534 = vrot.lane.b32.xlu0 %v2053_v12, %s1548_s11  ;;  %524 = vrot.lane.b32.xlu1 %v2055_v55, %s1546_s15  ;;  %v820_v56 = vpop.xlane.xlu0 %819 }
 0x34c   : > { %v821_v57 = vmul.f32 0.00390625, %v820_v56 }
 0x34e   : > { %v822_v58 = vadd.f32 1e-05, %v821_v57  ;;  %v2183_v57 = vld [vmem:[#allocation10 + $0x60] sm:$0xff] }
 0x34f   : > { %540 = vrot.lane.b32.xlu0 %v2053_v12, %s1549_s8  ;;  %530 = vrot.lane.b32.xlu1 %v2055_v55, %s1547_s16 }
 0x350   : > { %1313 = vrsqrt.f32 %v822_v58  ;;  %v2185_v58 = vld [vmem:[#allocation10 + $0x68] sm:$0xff] }
 0x353   : > { %546 = vrot.lane.b32.xlu0 %v2053_v12, %s1551_s30  ;;  %536 = vrot.lane.b32.xlu1 %v2055_v55, %s1548_s11 }
 0x357   : > { %552 = vrot.lane.b32.xlu0 %v2053_v12, %s1552_s10  ;;  %542 = vrot.lane.b32.xlu1 %v2055_v55, %s1549_s8 }
 0x35a   : > { %v1314_v61 = vpop.eup %1313 }
 0x35b   : > { %v824_v62 = vmul.f32 %v1314_v61, %v814_v10  ;;  %548 = vrot.lane.b32.xlu1 %v2055_v55, %s1551_s30  ;;  %v825_v27 = vmul.f32 %v1314_v61, %v815_v35 }
 0x35d   : > { %v2087_v1 = vmax.f32 %v824_v62, 0.0  ;;  %v2093_v28 = vmax.f32 %v825_v27, 0.0  ;;  %v2193_v27 = vld [vmem:[#allocation10 + $0x78] sm:$0xff] }
 0x35f   : > { %554 = vrot.lane.b32.xlu1 %v2055_v55, %s1552_s10  ;;  %828 = vrot.lane.b32.xlu0 %v2087_v1, %s1545_s24  ;;  %v2191_v55 = vld [vmem:[#allocation10 + $0x70] sm:$0xff] }
 0x363   : > { %830 = vrot.lane.b32.xlu1 %v2093_v28, %s1545_s24  ;;  %834 = vrot.lane.b32.xlu0 %v2087_v1, %s1544_s26  ;;  %s1553_s24 = smov [#allocation11]  }
 0x367   : > { %836 = vrot.lane.b32.xlu1 %v2093_v28, %s1544_s26  ;;  %840 = vrot.lane.b32.xlu0 %v2087_v1, %s1546_s15 }
 0x36b   : > { %842 = vrot.lane.b32.xlu1 %v2093_v28, %s1546_s15  ;;  %846 = vrot.lane.b32.xlu0 %v2087_v1, %s1547_s16  ;;  %s1465_s15 = sshll.u32 %s1553_s24, 4  ;;  %s1466_s15 = int_to_ptr.vmem [resolvable:$false] %s1465_s15 }
 0x36c   : > { %p1468_p3 = scmp.lt.s32.totalorder %s2280_s28, %s1466_s15 }
 0x36f   : > { %848 = vrot.lane.b32.xlu1 %v2093_v28, %s1547_s16  ;;  %852 = vrot.lane.b32.xlu0 %v2087_v1, %s1548_s11  ;;  %s1467_s16 = scalar_lea.vmem %s1466_s15, 1024 }
 0x370   : > { %p1469_p7 = scmp.lt.s32.totalorder %s1467_s16, %s1461_s22 }
 0x372   : > { %p1470_p10 = por %p1469_p7, %p1468_p3 }
 0x373   : > { %854 = vrot.lane.b32.xlu1 %v2093_v28, %s1548_s11  ;;  %858 = vrot.lane.b32.xlu0 %v2087_v1, %s1549_s8 }
 0x374   : > { %p1471_p13 = pnand %p1470_p10, %p1464_p8 }
 0x377   : > { %860 = vrot.lane.b32.xlu1 %v2093_v28, %s1549_s8  ;;  %864 = vrot.lane.b32.xlu0 %v2087_v1, %s1551_s30 }
 0x37b   : > { %866 = vrot.lane.b32.xlu1 %v2093_v28, %s1551_s30  ;;  %870 = vrot.lane.b32.xlu0 %v2087_v1, %s1552_s10 }
 0x37f   : > { %872 = vrot.lane.b32.xlu1 %v2093_v28, %s1552_s10 }
 0x3b1   : > { %v511_v5 = vpop.permute.xlu1 %510  ;;  %v513_v7 = vpop.permute.xlu0 %512 }
 0x3b2   : > { %v514_v13 = vsel %vm346_vm1, %v511_v5, %v513_v7  ;;  %v515_v14 = vsel %vm346_vm1, %v513_v7, %v511_v5 }
 0x3b3   : > { %v558_v16 = vmul.f32 %v515_v14, %v2125_v8  ;;  %v559_v19 = vmul.f32 %v514_v13, %v2133_v38 }
 0x3b5   : > { %v517_v31 = vpop.permute.xlu1 %516  ;;  %v523_v32 = vpop.permute.xlu0 %522 }
 0x3b9   : > { %v519_v37 = vpop.permute.xlu1 %518  ;;  %v529_v43 = vpop.permute.xlu0 %528 }
 0x3ba   : > { %v520_v15 = vsel %vm353_vm0, %v517_v31, %v519_v37  ;;  %v521_v44 = vsel %vm353_vm0, %v519_v37, %v517_v31 }
 0x3bb   : > { %v560_v18 = vmul.f32 %v521_v44, %v2131_v4  ;;  %v561_v21 = vmul.f32 %v520_v15, %v2135_v3 }
 0x3bd   : > { %v525_v22 = vpop.permute.xlu1 %524  ;;  %v535_v23 = vpop.permute.xlu0 %534  ;;  %v1164_v24 = vpack.c.bf16 %v561_v21, %v559_v19  ;;  %v1166_v25 = vpack.c.bf16 %v560_v18, %v558_v16  ;;  %v2207_v21 = vld [vmem:[#allocation10 + $0x80] sm:$0xff] }
 0x3be   : > { %v526_v26 = vsel %vm360_vm2, %v523_v32, %v525_v22  ;;  %v527_v29 = vsel %vm360_vm2, %v525_v22, %v523_v32 }
 0x3bf   : > { %1165 = vmatprep.subr.bf16.mxu1 %v1164_v24  ;;  %v562_v39 = vmul.f32 %v527_v29, %v2145_v59  ;;  %v563_v40 = vmul.f32 %v526_v26, %v2147_v60  ;;  %v2213_v29 = vld [vmem:[#allocation7] sm:$0xff] }
 0x3c0   : > { %1167 = vmatpush1.bf16.msra.mxu1 %v1166_v25 }
 0x3c1   : > { %v531_v30 = vpop.permute.xlu1 %530  ;;  %v541_v33 = vpop.permute.xlu0 %540 }
 0x3c2   : > { %v532_v34 = vsel %vm367_vm3, %v529_v43, %v531_v30  ;;  %v533_v36 = vsel %vm367_vm3, %v531_v30, %v529_v43  ;;  %v2203_v43 = vld [vmem:[#allocation10 + $0x88] sm:$0xff] }
 0x3c3   : > { %v564_v17 = vmul.f32 %v533_v36, %v2153_v63  ;;  %v565_v41 = vmul.f32 %v532_v34, %v2155_v0 }
 0x3c5   : > { %v537_v47 = vpop.permute.xlu1 %536  ;;  %v1168_v10 = vpack.c.bf16 %v565_v41, %v563_v40  ;;  %v1170_v35 = vpack.c.bf16 %v564_v17, %v562_v39  ;;  %v547_v51 = vpop.permute.xlu0 %546 }
 0x3c6   : > { %v538_v48 = vsel %vm374_vm4, %v535_v23, %v537_v47  ;;  %v539_v11 = vsel %vm374_vm4, %v537_v47, %v535_v23 }
 0x3c7   : > { %v568_v49 = vmul.f32 %v538_v48, %v2167_v20  ;;  %v569_v50 = vmul.f32 %v539_v11, %v2169_v45  ;;  %1169 = vmatprep.subr.bf16.mxu1 %v1168_v10 }
 0x3c8   : > { %1171 = vmatpush1.bf16.msra.mxu1 %v1170_v35 }
 0x3c9   : > { %v543_v54 = vpop.permute.xlu1 %542  ;;  %v1172_v9 = vpack.c.bf16 %v569_v50, %v567_v52  ;;  %v1174_v56 = vpack.c.bf16 %v568_v49, %v566_v53  ;;  %v553_v12 = vpop.permute.xlu0 %552 }
 0x3ca   : > { %v544_v61 = vsel %vm381_vm5, %v541_v33, %v543_v54  ;;  %v545_v62 = vsel %vm381_vm5, %v543_v54, %v541_v33 }
 0x3cb   : > { %1173 = vmatprep.subr.bf16.mxu1 %v1172_v9  ;;  %v570_v32 = vmul.f32 %v544_v61, %v2183_v57  ;;  %v571_v13 = vmul.f32 %v545_v62, %v2185_v58 }
 0x3cc   : > { %1175 = vmatpush1.bf16.msra.mxu1 %v1174_v56 }
 0x3cd   : > { %v549_v5 = vpop.permute.xlu1 %548 }
 0x3ce   : > { %v550_v7 = vsel %vm388_vm6, %v547_v51, %v549_v5  ;;  %v551_v31 = vsel %vm388_vm6, %v549_v5, %v547_v51 }
 0x3cf   : > { %v572_v14 = vmul.f32 %v550_v7, %v2191_v55  ;;  %v573_v37 = vmul.f32 %v551_v31, %v2193_v27  ;;  %v884_v7 = vmul.f32 %v2087_v1, %v2171_v46 }
 0x3d1   : > { %v555_v15 = vpop.permute.xlu1 %554  ;;  %v829_v44 = vpop.permute.xlu0 %828  ;;  %v1176_v16 = vpack.c.bf16 %v573_v37, %v571_v13  ;;  %v1178_v18 = vpack.c.bf16 %v572_v14, %v570_v32 }
 0x3d2   : > { %v557_v19 = vsel %vm395_vm7, %v555_v15, %v553_v12  ;;  %v556_v22 = vsel %vm395_vm7, %v553_v12, %v555_v15 }
 0x3d3   : > { %v575_v23 = vmul.f32 %v557_v19, %v2203_v43  ;;  %1177 = vmatprep.subr.bf16.mxu1 %v1176_v16  ;;  %v574_v26 = vmul.f32 %v556_v22, %v2207_v21 }
 0x3d4   : > { %1179 = vmatpush1.bf16.msra.mxu1 %v1178_v18 }
 0x3d5   : > { %v831_v24 = vpop.permute.xlu1 %830  ;;  %595 = vmatprep.subr.mxu1 %v575_v23  ;;  %v835_v25 = vpop.permute.xlu0 %834 }
 0x3d6   : > { %v832_v30 = vsel %vm346_vm1, %v829_v44, %v831_v24  ;;  %v833_v33 = vsel %vm346_vm1, %v831_v24, %v829_v44 }
 0x3d7   : > { %v876_v17 = vmul.f32 %v833_v33, %v2125_v8  ;;  %v877_v41 = vmul.f32 %v832_v30, %v2133_v38 }
 0x3d8   : > { %596 = vmatpush1.msra.mxu1 %v574_v26 }
 0x3d9   : > { %v837_v34 = vpop.permute.xlu1 %836  ;;  %1131 = vmatmul.mubr.msk.f32.vlgmr.msra.gmra.mrb[0].mxu1 %vm416_vm8, %v2213_v29  ;;  %v841_v36 = vpop.permute.xlu0 %840 }
 0x3da   : > { %v838_v39 = vsel %vm353_vm0, %v835_v25, %v837_v34  ;;  %v839_v40 = vsel %vm353_vm0, %v837_v34, %v835_v25  ;;  %958 = vmatprep.mubr.f32.mxu1 %v1550_v2 }
 0x3db   : > { %v878_v47 = vmul.f32 %v839_v40, %v2131_v4  ;;  %v879_v10 = vmul.f32 %v838_v39, %v2135_v3 }
 0x3dd   : > { %v1198_v35 = vpack.c.bf16 %v878_v47, %v876_v17  ;;  %v843_v48 = vpop.permute.xlu1 %842  ;;  %v847_v11 = vpop.permute.xlu0 %846  ;;  %v1196_v49 = vpack.c.bf16 %v879_v10, %v877_v41 }
 0x3de   : > { %v844_v50 = vsel %vm360_vm2, %v841_v36, %v843_v48  ;;  %v845_v51 = vsel %vm360_vm2, %v843_v48, %v841_v36 }
 0x3df   : > { %1197 = vmatprep.subr.bf16.mxu1 %v1196_v49  ;;  %v880_v3 = vmul.f32 %v845_v51, %v2145_v59  ;;  %v881_v52 = vmul.f32 %v844_v50, %v2147_v60 }
 0x3e0   : > { %1199 = vmatpush1.bf16.msra.mxu1 %v1198_v35 }
 0x3e1   : > { %v849_v2 = vpop.permute.xlu1 %848  ;;  %v853_v8 = vpop.permute.xlu0 %852 }
 0x3e2   : > { %v850_v38 = vsel %vm367_vm3, %v847_v11, %v849_v2  ;;  %v851_v4 = vsel %vm367_vm3, %v849_v2, %v847_v11 }
 0x3e3   : > { %v882_v53 = vmul.f32 %v851_v4, %v2153_v63  ;;  %v883_v54 = vmul.f32 %v850_v38, %v2155_v0  ;;  %v885_v63 = vmul.f32 %v2093_v28, %v2165_v42 }
 0x3e5   : > { %v1202_v9 = vpack.c.bf16 %v882_v53, %v880_v3  ;;  %v855_v56 = vpop.permute.xlu1 %854  ;;  %v859_v61 = vpop.permute.xlu0 %858  ;;  %v1200_v62 = vpack.c.bf16 %v883_v54, %v881_v52 }
 0x3e6   : > { %v856_v12 = vsel %vm374_vm4, %v853_v8, %v855_v56  ;;  %v857_v5 = vsel %vm374_vm4, %v855_v56, %v853_v8 }
 0x3e7   : > { %v886_v59 = vmul.f32 %v856_v12, %v2167_v20  ;;  %v887_v60 = vmul.f32 %v857_v5, %v2169_v45  ;;  %1201 = vmatprep.subr.bf16.mxu1 %v1200_v62 }
 0x3e8   : > { %1203 = vmatpush1.bf16.msra.mxu1 %v1202_v9 }
 0x3e9   : > { %v1206_v0 = vpack.c.bf16 %v886_v59, %v884_v7  ;;  %v861_v31 = vpop.permute.xlu1 %860  ;;  %v1204_v32 = vpack.c.bf16 %v887_v60, %v885_v63  ;;  %v865_v13 = vpop.permute.xlu0 %864 }
 0x3ea   : > { %v862_v14 = vsel %vm381_vm5, %v859_v61, %v861_v31  ;;  %v863_v1 = vsel %vm381_vm5, %v861_v31, %v859_v61 }
 0x3eb   : > { %1205 = vmatprep.subr.bf16.mxu1 %v1204_v32  ;;  %v888_v42 = vmul.f32 %v862_v14, %v2183_v57  ;;  %v889_v46 = vmul.f32 %v863_v1, %v2185_v58 }
 0x3ec   : > { %1207 = vmatpush1.bf16.msra.mxu1 %v1206_v0 }
 0x3ed   : > { %v867_v20 = vpop.permute.xlu1 %866  ;;  %v871_v16 = vpop.permute.xlu0 %870 }
 0x3ee   : > { %v868_v45 = vsel %vm388_vm6, %v865_v13, %v867_v20  ;;  %v869_v28 = vsel %vm388_vm6, %v867_v20, %v865_v13 }
 0x3ef   : > { %v890_v37 = vmul.f32 %v868_v45, %v2191_v55  ;;  %v891_v15 = vmul.f32 %v869_v28, %v2193_v27 }
 0x3f1   : > { %v1210_v44 = vpack.c.bf16 %v890_v37, %v888_v42  ;;  %v873_v18 = vpop.permute.xlu1 %872  ;;  %v1208_v19 = vpack.c.bf16 %v891_v15, %v889_v46 }
 0x3f2   : > { %v875_v22 = vsel %vm395_vm7, %v873_v18, %v871_v16  ;;  %v874_v23 = vsel %vm395_vm7, %v871_v16, %v873_v18 }
 0x3f3   : > { %v893_v24 = vmul.f32 %v875_v22, %v2203_v43  ;;  %1209 = vmatprep.subr.bf16.mxu1 %v1208_v19  ;;  %v892_v57 = vmul.f32 %v874_v23, %v2207_v21 }
 0x3f4   : > { %1211 = vmatpush1.bf16.msra.mxu1 %v1210_v44 }
 0x3f5   : > { %910 = vmatprep.subr.mxu1 %v893_v24 }
 0x3f8   : > { %911 = vmatpush1.msra.mxu1 %v892_v57 }
 0x3f9   : > { %1135 = vmatmul.mubr.msk.f32.vlgmr.msra.gmra.mrb[2].mxu1 %vm416_vm8, %v2213_v29 }
 0x4ac   : > { %v645_v58 = vpop.f32.mrb[0].mxu1 }
 0x4ad   : > { %v647_v55 = vpop.f32.mrb[1].mxu1 }
 0x4ae   : > { %v650_v27 = vadd.f32 %v647_v55, %v645_v58 }
 0x4b0   : > { %651 = vadd.xlane.f32.xlu0 %v650_v27 }
 0x4cc   : > { %v960_v25 = vpop.f32.mrb[2].mxu1 }
 0x4cd   : > { %v962_v26 = vpop.f32.mrb[3].mxu1 }
 0x4ce   : > { %v965_v30 = vadd.f32 %v962_v26, %v960_v25 }
 0x4d0   : > { %966 = vadd.xlane.f32.xlu1 %v965_v30 }
 0x53d   : > { %v652_v6 = vpop.xlane.xlu0 %651 }
 0x53e   : > { %v653_v33 = vmul.f32 0.00390625, %v652_v6 }
 0x540   : > { %v654_v43 = vsub.f32 %v645_v58, %v653_v33  ;;  %v655_v34 = vsub.f32 %v647_v55, %v653_v33 }
 0x542   : > { %v656_v36 = vmul.f32 %v654_v43, %v654_v43  ;;  %v657_v39 = vmul.f32 %v655_v34, %v655_v34 }
 0x544   : > { %v658_v40 = vadd.f32 %v657_v39, %v656_v36 }
 0x546   : > { %659 = vadd.xlane.f32.xlu0 %v658_v40 }
 0x55d   : > { %v967_v21 = vpop.xlane.xlu1 %966 }
 0x55e   : > { %v968_v17 = vmul.f32 0.00390625, %v967_v21 }
 0x560   : > { %v969_v29 = vsub.f32 %v960_v25, %v968_v17  ;;  %v970_v41 = vsub.f32 %v962_v26, %v968_v17 }
 0x562   : > { %v971_v47 = vmul.f32 %v969_v29, %v969_v29  ;;  %v972_v10 = vmul.f32 %v970_v41, %v970_v41 }
 0x564   : > { %v973_v35 = vadd.f32 %v972_v10, %v971_v47 }
 0x566   : > { %974 = vadd.xlane.f32.xlu0 %v973_v35 }
 0x5d3   : > { %v660_v48 = vpop.xlane.xlu0 %659 }
 0x5d4   : > { %v661_v11 = vmul.f32 0.00390625, %v660_v48 }
 0x5d6   : > { %v662_v49 = vadd.f32 1e-05, %v661_v11 }
 0x5d8   : > { %1315 = vrsqrt.f32 %v662_v49 }
 0x5e2   : > { %v1316_v50 = vpop.eup %1315 }
 0x5e3   : > { %v664_v51 = vmul.f32 %v1316_v50, %v654_v43  ;;  %v665_v2 = vmul.f32 %v1316_v50, %v655_v34 }
 0x5e5   : > { %v666_v8 = vmax.f32 %v664_v51, 0.0  ;;  %v667_v38 = vmax.f32 %v665_v2, 0.0 }
 0x5e7   : > { %668 = vst [vmem:[%s297_s29] sm:$0xff] %v666_v8  ;;  %669 = vst [vmem:[%s297_s29 + $0x8] sm:$0xff] %v667_v38 }
 0x5f3   : > { %v975_v4 = vpop.xlane.xlu0 %974 }
 0x5f4   : > { %v976_v3 = vmul.f32 0.00390625, %v975_v4 }
 0x5f6   : > { %v977_v52 = vadd.f32 1e-05, %v976_v3 }
 0x5f8   : > { %1317 = vrsqrt.f32 %v977_v52 }
 0x602   : > { %v1318_v53 = vpop.eup %1317 }
 0x603   : > { %v979_v54 = vmul.f32 %v1318_v53, %v969_v29  ;;  %v980_v9 = vmul.f32 %v1318_v53, %v970_v41 }
 0x605   : > { %v981_v56 = vmax.f32 %v979_v54, 0.0  ;;  %v982_v61 = vmax.f32 %v980_v9, 0.0 }
 0x607   : > { %1136 = vst [vmem:[%s297_s29 + $0x10] sm:$0xff] %v981_v56  ;;  %1137 = vst [vmem:[%s297_s29 + $0x18] sm:$0xff] %v982_v61 }
 0x608   : > { %1474 = shalt.err (!%p1471_p13)
}
 0x609   : > { %s1475_s11 = scalar_lea.hbm %s2278_s13, 512  ;;  %s1479_s10 = scalar_lea.hbm %s2330_s5, 1024 }
 0x60a   : > { %p1476_p0 = scmp.ne.s32.totalorder %s2278_s13, %s1475_s11  ;;  %p1480_p9 = scmp.lt.u32.totalorder %s2278_s13, %s2330_s5 }
 0x60b   : > { %p1481_p12 = scmp.lt.u32.totalorder %s1479_s10, %s1475_s11  ;;  %p1483_p4 = scmp.lt.u32.totalorder %s1475_s11, %s2278_s13 }
 0x60c   : > { %p1477_p5 = pnand %p1476_p0, %p1743_p1 }
 0x60d   : > { %p1482_p2 = por %p1481_p12, %p1480_p9 }
 0x60e   : > { %p1478_p11 = pneg %p1477_p5 }
 0x60f   : > { %p1484_p6 = por %p1483_p4, %p1482_p2 }
 0x611   : > { %p1485_p8 = pnand %p1484_p6, %p1478_p11 }
 0x613   : > { %1488 = shalt.err (!%p1485_p8)
}
 0x614   : > { %s1554_s7 = smov 256  }
 0x615   : > { %1230 = dma.vmem_to_hbm [thread:$0]  (%p1743_p1), %s2280_s28, 512, %s2278_s13, %s987_s23, %s1554_s7, %s1554_s7, %s1544_s26  }
 0x616 PF: > { %s1016_s9 = sand.u32 1, %s1523_s18   ;;  %p2348_p3 = scmp.ne.s32.totalorder %s2335_s25, 0 }
 0x617   : > { %p2349_p7 = scmp.ge.s32.totalorder %s1535_s21, 2  ;;  %s1017_s22 = scalar_lea.sflag [#allocation4], %s1016_s9 }
 0x619   : > { %p1250_p10 = pnand %p2349_p7, %p2348_p3 }
 0x61b   : > { %1518 = dma.done.wait (!%p1250_p10), %s1017_s22, 512  }
 0x61c   : > { %1520 = vsyncadd (!%p1250_p10), %s1017_s22, 4294966784  ;;  %p20_p13 = scmp.ge.s32.totalorder %s1733_s14, 4   ;;  %s2350_s18 = smov %s1527_s19 }
 0x61d   : > { %s2351_s19 = smov %s1531_s20  ;;  %s2352_s20 = smov %s1749_s27 }
 0x61e   : > { %s2353_s21 = smov %s1733_s14  ;;  %22 = sbr.rel (!%p20_p13) target bundleno = 7 (0x7), region = 103 }
 0x625   :  { %1022 = vsyncpa [#allocation3], 1 }
 0x626   :  { %1024 = vsyncpa [#allocation3 + $0x1], 1 }
 0x627   :  { %1025 = vsyncpa [#allocation6], 1 }
 0x628   :  { %1026 = vsyncpa [#allocation9], 1 }
 0x629   :  { %1027 = vsyncpa [#allocation4], 1 }
 0x62a   :  { %1029 = vsyncpa [#allocation4 + $0x1], 1 }

</bundles_post_ra>
